<compile_context>
chip_gen: v7x
topology: tpu7x:2x2x1
jax: 0.10.0
libtpu: 0.0.40
codegen_flags: <defaults>
</compile_context>

<pallas_src>
import functools

import jax
import jax.numpy as jnp
from jax.experimental import pallas as pl
from jax.experimental.pallas import tpu as pltpu

F_PAD = 128   # lane-dense feature width for every layer (>= all true feature dims)
B_BLK = 8     # graphs per grid step; B_BLK * N == 128 rows per block


def _gcn_batched_kernel(x_ref, adj_ref, params_ref, out_ref, *,
                        num_layers, slope, f_pad):
    """One grid step = B_BLK graphs, all layers fused, everything VMEM-resident.

    x_ref      : (B_BLK*N, F_PAD)        padded node features, batch flattened to rows
    adj_ref    : (B_BLK*N, B_BLK*N)      block-diagonal kron(I_B_BLK, adj) (grid-invariant)
    params_ref : (L, F_PAD+8, F_PAD)     per layer: rows [0:F_PAD] = padded W,
                                         row F_PAD = padded bias, rest zero
    out_ref    : (B_BLK*N, F_PAD)
    """
    adj = adj_ref[...]                       # loaded once, reused by every layer
    h = x_ref[...]
    total = num_layers + 1
    for layer in range(total):               # statically unrolled
        w = params_ref[layer, :f_pad, :]                 # (F_PAD, F_PAD), static slice
        b = params_ref[layer, f_pad:f_pad + 1, :]        # (1, F_PAD), static slice
        h = jnp.dot(h, w, preferred_element_type=jnp.float32)     # x @ W
        h = jnp.dot(adj, h, preferred_element_type=jnp.float32)   # adj @ support
        h = h + b
        if layer < num_layers:               # hidden layers only: LeakyReLU
            h = jnp.where(h > 0, h, slope * h)
    out_ref[...] = h.astype(out_ref.dtype)


def gcn_forward(x, adj, weights, biases, *, lrelu_slope,
                b_blk=B_BLK, f_pad=F_PAD):
    """Batched fused GCN forward.  x: (B, N, in_features) or (N, in_features)."""
    squeeze = False
    if x.ndim == 2:
        x = x[None]
        squeeze = True
    B, N, fin0 = x.shape
    num_layers = len(weights) - 1
    L = num_layers + 1
    out_features = weights[-1].shape[1]
    assert max(max(w.shape) for w in weights) <= f_pad

    # Pad batch to a multiple of b_blk (padded graphs compute garbage, then discarded).
    B_pad = ((B + b_blk - 1) // b_blk) * b_blk
    x_p = jnp.zeros((B_pad, N, f_pad), jnp.float32)
    x_p = x_p.at[:B, :, :fin0].set(x.astype(jnp.float32))
    x_rows = x_p.reshape(B_pad * N, f_pad)                      # lane-dense row slab

    # Block-diagonal adjacency: one dense MXU matmul covers b_blk graphs.
    adj_blk = jnp.kron(jnp.eye(b_blk, dtype=jnp.float32), adj.astype(jnp.float32))

    # One packed parameter slab: (L, f_pad + 8, f_pad).
    slab = jnp.zeros((L, f_pad + 8, f_pad), jnp.float32)
    for l, (w, b) in enumerate(zip(weights, biases)):
        fin, fout = w.shape
        slab = slab.at[l, :fin, :fout].set(jnp.asarray(w, jnp.float32))
        slab = slab.at[l, f_pad, :fout].set(jnp.asarray(b, jnp.float32))

    rows_blk = b_blk * N
    steps = B_pad // b_blk

    # Advisory cost hint for XLA's scheduler.
    per_layer_flops = 2 * rows_blk * f_pad * f_pad + 2 * rows_blk * rows_blk * f_pad
    flops = steps * L * per_layer_flops
    bytes_accessed = 4 * (x_rows.size + adj_blk.size + slab.size + B_pad * N * f_pad)

    kernel = functools.partial(_gcn_batched_kernel, num_layers=num_layers,
                               slope=lrelu_slope, f_pad=f_pad)

    out_rows = pl.pallas_call(
        kernel,
        out_shape=jax.ShapeDtypeStruct((B_pad * N, f_pad), jnp.float32),
        grid_spec=pltpu.PrefetchScalarGridSpec(
            num_scalar_prefetch=0,
            grid=(steps,),
            in_specs=[
                pl.BlockSpec((rows_blk, f_pad), lambda i: (i, 0)),            # x rows
                pl.BlockSpec((rows_blk, rows_blk), lambda i: (0, 0)),         # adj (invariant)
                pl.BlockSpec((L, f_pad + 8, f_pad), lambda i: (0, 0, 0)),     # params (invariant)
            ],
            out_specs=pl.BlockSpec((rows_blk, f_pad), lambda i: (i, 0)),
        ),
        compiler_params=pltpu.CompilerParams(
            dimension_semantics=("parallel",),          # shards batch across v7x's 2 TCs
            vmem_limit_bytes=32 * 1024 * 1024,          # fits every generation (v7x: 64 MiB phys)
        ),
        cost_estimate=pl.CostEstimate(flops=flops, transcendentals=0,
                                      bytes_accessed=bytes_accessed),
    )(x_rows, adj_blk, slab)

    out = out_rows.reshape(B_pad, N, f_pad)[:B, :, :out_features]
    if squeeze:
        out = out[0]
    return out


def gcn_forward_ref(x, adj, weights, biases, *, lrelu_slope):
    """Pure-JAX reference mirroring GraphConvolutionNetwork.forward."""
    num_layers = len(weights) - 1

    def single(h):
        for layer in range(num_layers + 1):
            h = adj @ (h @ weights[layer]) + biases[layer][None, :]
            if layer < num_layers:
                h = jnp.where(h > 0, h, lrelu_slope * h)
        return h

    if x.ndim == 2:
        return single(x)
    return jax.vmap(single)(x)


if __name__ == "__main__":
    # Module config: in_features=8, hidden_dims=[32, 32], out_features=4,
    # num_layers=2, dropout=0.1 (no-op: F.dropout result is discarded),
    # lrelu_slope=0.2, gnn_residual=False (default).  Batched over B graphs.
    N = 16
    in_features = 8
    hidden_dims = [32, 32]
    out_features = 4
    num_layers = 2
    lrelu_slope = 0.2
    B = 32

    key = jax.random.PRNGKey(0)
    k_adj, k_x, k_p = jax.random.split(key, 3)

    # Adjacency buffer: symmetric, self-loops, D^-1/2 A D^-1/2 normalization.
    a = (jax.random.uniform(k_adj, (N, N)) > 0.6).astype(jnp.float32)
    a = jnp.maximum(jnp.maximum(a, a.T), jnp.eye(N, dtype=jnp.float32))
    d_inv_sqrt = 1.0 / jnp.sqrt(jnp.sum(a, axis=-1))
    adj = a * d_inv_sqrt[:, None] * d_inv_sqrt[None, :]

    x = jax.random.normal(k_x, (B, N, in_features), dtype=jnp.float32)

    # Per-layer weights/biases (num_layers hidden GCN layers + 1 output layer).
    dims = [in_features] + hidden_dims + [out_features]
    weights, biases = [], []
    keys = jax.random.split(k_p, len(dims) - 1)
    for layer, kk in enumerate(keys):
        fin, fout = dims[layer], dims[layer + 1]
        bound = float(1.0 / (fin ** 0.5))
        kw, kb = jax.random.split(kk)
        weights.append(jax.random.uniform(kw, (fin, fout), minval=-bound,
                                          maxval=bound, dtype=jnp.float32))
        biases.append(jax.random.uniform(kb, (fout,), minval=-bound,
                                         maxval=bound, dtype=jnp.float32))

    out = gcn_forward(x, adj, weights, biases, lrelu_slope=lrelu_slope)
    out = jax.block_until_ready(out)

    ref = gcn_forward_ref(x, adj, weights, biases, lrelu_slope=lrelu_slope)

    assert out.shape == (B, N, out_features), out.shape
    assert bool(jnp.all(jnp.isfinite(out)))
    assert bool(jnp.allclose(out, ref, atol=1e-4, rtol=1e-4)), \
        float(jnp.max(jnp.abs(out - ref)))
    print("KERNEL_OK")
</pallas_src>

<mosaic_0001>
module attributes {stable_mosaic.version = 11 : i64} {
  func.func @_gcn_batched_kernel(%arg0: i32, %arg1: memref<128x128xf32, #tpu.memory_space<vmem>>, %arg2: memref<128x128xf32, #tpu.memory_space<vmem>>, %arg3: memref<3x136x128xf32, #tpu.memory_space<vmem>>, %arg4: memref<128x128xf32, #tpu.memory_space<vmem>>) attributes {dimension_semantics = [#tpu.dimension_semantics<parallel>], iteration_bounds = array<i64: 4>, scalar_prefetch = 0 : i64, scratch_operands = 0 : i64, tpu.core_type = #tpu.core_type<tc>, window_params = [{transform_indices = @transform_0, window_bounds = array<i64: 128, 128>}, {pipeline_mode = #tpu.pipeline_mode<synchronous>, transform_indices = @transform_1, window_bounds = array<i64: 128, 128>}, {pipeline_mode = #tpu.pipeline_mode<synchronous>, transform_indices = @transform_2, window_bounds = array<i64: 3, 136, 128>}, {transform_indices = @transform_3, window_bounds = array<i64: 128, 128>}]} {
    %c0 = arith.constant 0 : index
    %c0_0 = arith.constant 0 : index
    %0 = vector.load %arg2[%c0, %c0_0] : memref<128x128xf32, #tpu.memory_space<vmem>>, vector<128x128xf32>
    %c0_1 = arith.constant 0 : index
    %c0_2 = arith.constant 0 : index
    %1 = vector.load %arg1[%c0_1, %c0_2] : memref<128x128xf32, #tpu.memory_space<vmem>>, vector<128x128xf32>
    %c0_3 = arith.constant 0 : index
    %c0_4 = arith.constant 0 : index
    %c0_5 = arith.constant 0 : index
    %2 = vector.load %arg3[%c0_3, %c0_4, %c0_5] : memref<3x136x128xf32, #tpu.memory_space<vmem>>, vector<1x128x128xf32>
    %3 = vector.shape_cast %2 : vector<1x128x128xf32> to vector<128x128xf32>
    %c0_6 = arith.constant 0 : index
    %c128 = arith.constant 128 : index
    %c0_7 = arith.constant 0 : index
    %4 = vector.load %arg3[%c0_6, %c128, %c0_7] : memref<3x136x128xf32, #tpu.memory_space<vmem>>, vector<1x1x128xf32>
    %5 = vector.shape_cast %4 : vector<1x1x128xf32> to vector<1x128xf32>
    %cst = arith.constant dense<0.000000e+00> : vector<128x128xf32>
    %6 = tpu.matmul %1, %3, %cst {dimension_numbers = #tpu.dot_dimension_numbers<[1], [0], [0], [1], [0, 0, 1, 1], [], []>} : vector<128x128xf32>, vector<128x128xf32>, vector<128x128xf32> -> vector<128x128xf32>
    %cst_8 = arith.constant dense<0.000000e+00> : vector<128x128xf32>
    %7 = tpu.matmul %0, %6, %cst_8 {dimension_numbers = #tpu.dot_dimension_numbers<[1], [0], [0], [1], [0, 0, 1, 1], [], []>} : vector<128x128xf32>, vector<128x128xf32>, vector<128x128xf32> -> vector<128x128xf32>
    %8 = vector.broadcast %5 : vector<1x128xf32> to vector<128x128xf32>
    %9 = arith.addf %7, %8 : vector<128x128xf32>
    %cst_9 = arith.constant 0.000000e+00 : f32
    %10 = vector.broadcast %cst_9 : f32 to vector<128x128xf32>
    %11 = arith.cmpf ogt, %9, %10 : vector<128x128xf32>
    %cst_10 = arith.constant 2.000000e-01 : f32
    %12 = vector.broadcast %cst_10 : f32 to vector<128x128xf32>
    %13 = arith.mulf %12, %9 : vector<128x128xf32>
    %14 = arith.select %11, %9, %13 : vector<128x128xi1>, vector<128x128xf32>
    %c1 = arith.constant 1 : index
    %c0_11 = arith.constant 0 : index
    %c0_12 = arith.constant 0 : index
    %15 = vector.load %arg3[%c1, %c0_11, %c0_12] : memref<3x136x128xf32, #tpu.memory_space<vmem>>, vector<1x128x128xf32>
    %16 = vector.shape_cast %15 : vector<1x128x128xf32> to vector<128x128xf32>
    %c1_13 = arith.constant 1 : index
    %c128_14 = arith.constant 128 : index
    %c0_15 = arith.constant 0 : index
    %17 = vector.load %arg3[%c1_13, %c128_14, %c0_15] : memref<3x136x128xf32, #tpu.memory_space<vmem>>, vector<1x1x128xf32>
    %18 = vector.shape_cast %17 : vector<1x1x128xf32> to vector<1x128xf32>
    %cst_16 = arith.constant dense<0.000000e+00> : vector<128x128xf32>
    %19 = tpu.matmul %14, %16, %cst_16 {dimension_numbers = #tpu.dot_dimension_numbers<[1], [0], [0], [1], [0, 0, 1, 1], [], []>} : vector<128x128xf32>, vector<128x128xf32>, vector<128x128xf32> -> vector<128x128xf32>
    %cst_17 = arith.constant dense<0.000000e+00> : vector<128x128xf32>
    %20 = tpu.matmul %0, %19, %cst_17 {dimension_numbers = #tpu.dot_dimension_numbers<[1], [0], [0], [1], [0, 0, 1, 1], [], []>} : vector<128x128xf32>, vector<128x128xf32>, vector<128x128xf32> -> vector<128x128xf32>
    %21 = vector.broadcast %18 : vector<1x128xf32> to vector<128x128xf32>
    %22 = arith.addf %20, %21 : vector<128x128xf32>
    %cst_18 = arith.constant 0.000000e+00 : f32
    %23 = vector.broadcast %cst_18 : f32 to vector<128x128xf32>
    %24 = arith.cmpf ogt, %22, %23 : vector<128x128xf32>
    %cst_19 = arith.constant 2.000000e-01 : f32
    %25 = vector.broadcast %cst_19 : f32 to vector<128x128xf32>
    %26 = arith.mulf %25, %22 : vector<128x128xf32>
    %27 = arith.select %24, %22, %26 : vector<128x128xi1>, vector<128x128xf32>
    %c2 = arith.constant 2 : index
    %c0_20 = arith.constant 0 : index
    %c0_21 = arith.constant 0 : index
    %28 = vector.load %arg3[%c2, %c0_20, %c0_21] : memref<3x136x128xf32, #tpu.memory_space<vmem>>, vector<1x128x128xf32>
    %29 = vector.shape_cast %28 : vector<1x128x128xf32> to vector<128x128xf32>
    %c2_22 = arith.constant 2 : index
    %c128_23 = arith.constant 128 : index
    %c0_24 = arith.constant 0 : index
    %30 = vector.load %arg3[%c2_22, %c128_23, %c0_24] : memref<3x136x128xf32, #tpu.memory_space<vmem>>, vector<1x1x128xf32>
    %31 = vector.shape_cast %30 : vector<1x1x128xf32> to vector<1x128xf32>
    %cst_25 = arith.constant dense<0.000000e+00> : vector<128x128xf32>
    %32 = tpu.matmul %27, %29, %cst_25 {dimension_numbers = #tpu.dot_dimension_numbers<[1], [0], [0], [1], [0, 0, 1, 1], [], []>} : vector<128x128xf32>, vector<128x128xf32>, vector<128x128xf32> -> vector<128x128xf32>
    %cst_26 = arith.constant dense<0.000000e+00> : vector<128x128xf32>
    %33 = tpu.matmul %0, %32, %cst_26 {dimension_numbers = #tpu.dot_dimension_numbers<[1], [0], [0], [1], [0, 0, 1, 1], [], []>} : vector<128x128xf32>, vector<128x128xf32>, vector<128x128xf32> -> vector<128x128xf32>
    %34 = vector.broadcast %31 : vector<1x128xf32> to vector<128x128xf32>
    %35 = arith.addf %33, %34 : vector<128x128xf32>
    %c0_27 = arith.constant 0 : index
    %c0_28 = arith.constant 0 : index
    %36 = vector.load %arg4[%c0_27, %c0_28] : memref<128x128xf32, #tpu.memory_space<vmem>>, vector<128x128xf32>
    tpu.vector_store %arg4[%c0_27, %c0_28], %35 {strides = array<i32>} : memref<128x128xf32, #tpu.memory_space<vmem>>, vector<128x128xf32>,
    return
  }
  func.func @transform_0(%arg0: i32) -> (i32, i32) {
    %c0_i32 = arith.constant 0 : i32
    %c0_i32_0 = arith.constant 0 : i32
    return %arg0, %c0_i32 : i32, i32
  }
  func.func @transform_1(%arg0: i32) -> (i32, i32) {
    %c0_i32 = arith.constant 0 : i32
    %c0_i32_0 = arith.constant 0 : i32
    %c0_i32_1 = arith.constant 0 : i32
    return %c0_i32, %c0_i32_0 : i32, i32
  }
  func.func @transform_2(%arg0: i32) -> (i32, i32, i32) {
    %c0_i32 = arith.constant 0 : i32
    %c0_i32_0 = arith.constant 0 : i32
    %c0_i32_1 = arith.constant 0 : i32
    %c0_i32_2 = arith.constant 0 : i32
    return %c0_i32, %c0_i32_0, %c0_i32_1 : i32, i32, i32
  }
  func.func @transform_3(%arg0: i32) -> (i32, i32) {
    %c0_i32 = arith.constant 0 : i32
    %c0_i32_0 = arith.constant 0 : i32
    return %arg0, %c0_i32 : i32, i32
  }
}

</mosaic_0001>

<bundles_post_ra>
// kernel: tpu_custom_call.1
= control target key start
LH: loop header
LB: loop body
LE: loop exit
PB: predicated region body
PF: predicated region fallthrough
CT: control target
= control target key end

     0   :  { %8 = vsyncpa [#allocation3], 0  ;;  %s2796_s0 = inlined_call_operand.hbm [shape: f32[512,128], index: 0, kind: input, shape index: {}]   ;;  %s2797_s1 = inlined_call_operand.hbm [shape: f32[128,128], index: 1, kind: input, shape index: {}]   ;;  %s2798_s2 = inlined_call_operand.hbm [shape: f32[3,136,128], index: 2, kind: input, shape index: {}]   ;;  %s2799_s3 = inlined_call_operand.hbm [shape: f32[512,128], index: 3, kind: output, shape index: {}]  }
   0x1   :  { %10 = vsyncpa [#allocation3 + $0x1], 0 }
   0x2   :  { %11 = vsyncpa [#allocation6], 0 }
   0x3   :  { %12 = vsyncpa [#allocation4], 0 }
   0x4   :  { %14 = vsyncpa [#allocation4 + $0x1], 0  ;;  %s2405_s12 = smov 0   ;;  %s2407_s13 = smov 0  }
   0x5   :  { %s2409_s14 = smov 0   ;;  %s2411_s15 = smov 0  }
   0x6 LB: > { %s2426_s16 = sadd.s32 4294967295, %s2375_s15   ;;  %s1405_s17 = sadd.s32 4294967294, %s2375_s15   ;;  %s2375_s15 = sphi %s2411_s15, %s2818_s15   ;;  %s2371_s14 = sphi %s2409_s14, %s2817_s14   ;;  %s2367_s13 = sphi %s2407_s13, %s2816_s13   ;;  %s2363_s12 = sphi %s2405_s12, %s2815_s12  }
   0x7   : > { %p40_p0 = scmp.ne.s32.totalorder %s2367_s13, %s2363_s12  ;;  %p2800_p1 = scmp.eq.s32.totalorder %s2426_s16, 0 }
   0x8   : > { %p112_p3 = scmp.eq.s32.totalorder %s1405_s17, 3  ;;  %p1406_p5 = scmp.ge.s32.totalorder %s2375_s15, 1 }
   0x9   : > { %p2435_p4 = por %p2800_p1, %p40_p0  ;;  %p119_p7 = scmp.lt.s32.totalorder %s2375_s15, 5 }
   0xa   : > { %p2440_p6 = por %p112_p3, %p40_p0  ;;  %s2377_s21 = smov [#allocation5]  }
   0xb   : > { %s2803_s18 = scalar_select %p2435_p4, 1, 0 }
   0xc   : > { %s2804_s19 = scalar_select %p2440_p6, 1, 0 }
   0xd   : > { %p2445_p8 = pnand %p1406_p5, %p119_p7  ;;  %s131_s22 = sshll.u32 %s2377_s21, 4  ;;  %s132_s22 = int_to_ptr.vmem [resolvable:$true] %s131_s22 }
   0xe   : > { %s2378_s24 = smov [#allocation7]   ;;  %s2219_s28 = scalar_lea.hbm %s2797_s1, 2048 }
   0xf   : > { %s2805_s20 = scalar_select %p2445_p8, 1, 0 }
  0x10   : > { %p2160_p9 = pneg %p2445_p8  ;;  %s144_s25 = sshll.u32 %s2378_s24, 4  ;;  %s2457_s25 = int_to_ptr.vmem [resolvable:$true] %s144_s25 }
  0x11   : > { %p2220_p11 = scmp.ne.s32.totalorder %s2797_s1, %s2219_s28  ;;  %p2226_p3 = scmp.lt.u32.totalorder %s2219_s28, %s2797_s1 }
  0x12   : > { %p2453_p10 = pnand %p2160_p9, %p2800_p1 }
  0x14   : > { %p2221_p12 = pneg %p2453_p10 }
  0x16   : > { %p2222_p13 = pnand %p2221_p12, %p2220_p11 }
  0x18   : > { %p2223_p0 = pneg %p2222_p13 }
  0x1a   : > { %p2228_p5 = pnand %p2226_p3, %p2223_p0 }
  0x1c   : > { %2231 = shalt.err (!%p2228_p5)
}
  0x1d   : > { %s2232_s6 = scalar_lea.vmem %s132_s22, 2048  ;;  %p2240_p2 = scmp.lt.s32.totalorder %s132_s22, %s132_s22 }
  0x1e   : > { %p2233_p7 = scmp.ne.s32.totalorder %s132_s22, %s2232_s6  ;;  %p2241_p6 = scmp.lt.s32.totalorder %s2232_s6, %s2232_s6 }
  0x20   : > { %p2235_p9 = pnand %p2233_p7, %p2221_p12  ;;  %p2242_p4 = por %p2241_p6, %p2240_p2 }
  0x22   : > { %p2236_p1 = pneg %p2235_p9 }
  0x24   : > { %p2243_p8 = pnand %p2242_p4, %p2236_p1 }
  0x26   : > { %2246 = shalt.err (!%p2243_p8)
}
  0x27   : > { %s2379_s7 = smov 128   ;;  %s2380_s8 = smov 8  }
  0x28   : > { %2163 = dma.hbm_to_vmem [thread:$0]  (!%p2453_p10), %s2797_s1, 2048, %s132_s22, [#allocation6], %s2379_s7, %s2379_s7, %s2380_s8  }
  0x29   : > { %s2247_s21 = scalar_lea.hbm %s2798_s2, 6528 }
  0x2a   : > { %p2248_p1 = scmp.ne.s32.totalorder %s2798_s2, %s2247_s21  ;;  %p2254_p6 = scmp.lt.u32.totalorder %s2247_s21, %s2798_s2 }
  0x2c   : > { %p2250_p2 = pnand %p2248_p1, %p2221_p12 }
  0x2e   : > { %p2251_p4 = pneg %p2250_p2 }
  0x30   : > { %p2256_p8 = pnand %p2254_p6, %p2251_p4 }
  0x32   : > { %2259 = shalt.err (!%p2256_p8)
}
  0x33   : > { %s2260_s22 = scalar_lea.vmem %s2457_s25, 6528  ;;  %p2268_p3 = scmp.lt.s32.totalorder %s2457_s25, %s2457_s25 }
  0x34   : > { %p2261_p11 = scmp.ne.s32.totalorder %s2457_s25, %s2260_s22  ;;  %p2269_p5 = scmp.lt.s32.totalorder %s2260_s22, %s2260_s22 }
  0x36   : > { %p2263_p13 = pnand %p2261_p11, %p2221_p12  ;;  %p2270_p7 = por %p2269_p5, %p2268_p3 }
  0x38   : > { %p2264_p0 = pneg %p2263_p13 }
  0x3a   : > { %p2271_p9 = pnand %p2270_p7, %p2264_p0 }
  0x3c   : > { %2274 = shalt.err (!%p2271_p9)
}
  0x3d   : > { %2166 = dma.hbm_to_vmem [thread:$0]  (!%p2453_p10), %s2798_s2, 6528, %s2457_s25, [#allocation6], %s2379_s7, %s2379_s7, %s2380_s8  }
  0x3e   : > { %s2513_s23 = sadd.s32 1, %s2375_s15   ;;  %s27_s4 = sadd.s32 1, %s2371_s14 }
  0x3f   : > { %s24_s5 = ssub.s32 %s2375_s15, %s2513_s23  ;;  %p34_p12 = scmp.ne.s32.totalorder %s2371_s14, %s2367_s13 }
  0x40   : > { %p25_p1 = scmp.eq.s32.totalorder %s24_s5, 0  ;;  %p35_p2 = scmp.eq.s32.totalorder %s2375_s15, 0 }
  0x41   : > { %p2807_p4 = scmp.eq.s32.totalorder %s2426_s16, 3  ;;  %p2177_p8 = scmp.lt.s32.totalorder %s2375_s15, 4 }
  0x42   : > { %s2529_s9 = scalar_select %p25_p1, %s2371_s14, %s27_s4  }
  0x43   : > { %p2523_p6 = por %p2807_p4, %p34_p12  ;;  %p36_p11 = por %p35_p2, %p34_p12 }
  0x44   : > { %s158_s10 = sand.u32 1, %s2371_s14   ;;  %s1426_s25 = sshll.u32 %s2375_s15, 11 }
  0x45   : > { %s1410_s11 = sshll.u32 %s158_s10, 7  ;;  %s2536_s24 = scalar_lea.hbm %s2796_s0, %s1426_s25 }
  0x46   : > { %s162_s26 = scalar_lea.vmem [#allocation2], %s1410_s11  ;;  %p2540_p10 = pnand %p2177_p8, %p36_p11 }
  0x47   : > { %s169_s27 = sshll.u32 %s162_s26, 4  ;;  %s2544_s22 = scalar_lea.sflag [#allocation3], %s158_s10  ;;  %s2538_s27 = int_to_ptr.vmem [resolvable:$true] %s169_s27 }
  0x48   : > { %s2275_s29 = scalar_lea.hbm %s2536_s24, 2048  ;;  %p2277_p0 = pneg %p2540_p10 }
  0x49   : > { %p2276_p13 = scmp.ne.s32.totalorder %s2536_s24, %s2275_s29  ;;  %s2280_s5 = scalar_lea.hbm %s2796_s0, 8192 }
  0x4a   : > { %p2281_p7 = scmp.lt.u32.totalorder %s2536_s24, %s2796_s0  ;;  %p2282_p9 = scmp.lt.u32.totalorder %s2280_s5, %s2275_s29 }
  0x4b   : > { %p2278_p3 = pnand %p2277_p0, %p2276_p13  ;;  %p2284_p1 = scmp.lt.u32.totalorder %s2275_s29, %s2536_s24 }
  0x4c   : > { %p2283_p12 = por %p2282_p9, %p2281_p7 }
  0x4d   : > { %p2279_p5 = pneg %p2278_p3 }
  0x4e   : > { %p2285_p2 = por %p2284_p1, %p2283_p12 }
  0x50   : > { %p2286_p4 = pnand %p2285_p2, %p2279_p5 }
  0x52   : > { %2289 = shalt.err (!%p2286_p4)
}
  0x53   : > { %s2290_s10 = scalar_lea.vmem %s2538_s27, 2048  ;;  %s2381_s17 = smov [#allocation2]  }
  0x54   : > { %p2291_p8 = scmp.ne.s32.totalorder %s2538_s27, %s2290_s10  ;;  %s2295_s21 = sshll.u32 %s2381_s17, 4  ;;  %s2296_s21 = int_to_ptr.vmem [resolvable:$false] %s2295_s21 }
  0x55   : > { %s2297_s26 = scalar_lea.vmem %s2296_s21, 4096  ;;  %p2298_p3 = scmp.lt.s32.totalorder %s2538_s27, %s2296_s21 }
  0x56   : > { %p2293_p11 = pnand %p2291_p8, %p2277_p0  ;;  %p2299_p7 = scmp.lt.s32.totalorder %s2297_s26, %s2290_s10 }
  0x58   : > { %p2294_p13 = pneg %p2293_p11  ;;  %p2300_p9 = por %p2299_p7, %p2298_p3 }
  0x5a   : > { %p2301_p12 = pnand %p2300_p9, %p2294_p13 }
  0x5c   : > { %2304 = shalt.err (!%p2301_p12)
}
  0x5d   : > { %2170 = dma.hbm_to_vmem [thread:$0]  (!%p2540_p10), %s2536_s24, 2048, %s2538_s27, %s2544_s22, %s2379_s7, %s2379_s7, %s2380_s8  }
  0x5e   : > { %p2810_p0 = scmp.ne.s32.totalorder %s2805_s20, 0 }
  0x5f   : > { %s2578_s29 = sand.u32 (!%p2810_p0), 1, %s2367_s13   ;;  %p2811_p5 = scmp.ne.s32.totalorder (!%p2810_p0), %s2803_s18, 0 }
  0x60   : > { %181 = sbr.rel (%p2810_p0) target bundleno = 1579 (0x62b), region = 32  ;;  %s1414_s30 = sshll.u32 (!%p2810_p0), %s2578_s29, 7 }
  0x61   : > { %s184_s4 = scalar_lea.sflag (!%p2810_p0), [#allocation3], %s2578_s29  ;;  %s2584_s28 = scalar_lea.vmem (!%p2810_p0), [#allocation2], %s1414_s30 }
  0x67   : > { %2350 = dma.done.wait (%p2811_p5), %s184_s4, 2048  }
  0x68   : > { %2352 = vsyncadd (%p2811_p5), %s184_s4, 4294965248  ;;  %p2812_p10 = scmp.eq.s32.totalorder %s2426_s16, 0 }
  0x6a   : > { %2354 = dma.done.wait (%p2812_p10), [#allocation6], 8576   ;;  %p2813_p1 = pmov %p2812_p10 }
  0x6b   : > { %v252_v0 = vld [vmem:[#allocation7] sm:$0xff]  ;;  %v253_v1 = vld [vmem:[#allocation7 + $0x8] sm:$0xff]  ;;  %v254_v2 = vld [vmem:[#allocation7 + $0x10] sm:$0xff]  ;;  %s2728_s18 = scalar_lea.vmem [#allocation8], %s1414_s30  ;;  %s1427_s20 = sshll.u32 %s2426_s16, 11 }
  0x6c   : > { %2356 = vsyncadd (%p2813_p1), [#allocation6], 4294958720  ;;  %v1956_v3 = vpack.c.bf16 %v253_v1, %v252_v0  ;;  %v255_v4 = vld [vmem:[#allocation7 + $0x18] sm:$0xff]  ;;  %v256_v6 = vld [vmem:[#allocation7 + $0x20] sm:$0xff]  ;;  %s1313_s7 = sshll.u32 %s2728_s18, 4  ;;  %s2749_s27 = scalar_lea.hbm %s2799_s3, %s1427_s20  ;;  %s2751_s7 = int_to_ptr.vmem [resolvable:$true] %s1313_s7 }
  0x6d   : > { %v1960_v5 = vpack.c.bf16 %v255_v4, %v254_v2  ;;  %v257_v7 = vld [vmem:[#allocation7 + $0x28] sm:$0xff]  ;;  %v236_v9 = vld [vmem:[%s2584_s28] sm:$0xff]  ;;  %v258_v10 = vld [vmem:[#allocation7 + $0x30] sm:$0xff]  ;;  %s1300_s16 = scalar_lea.sflag [#allocation4], %s2578_s29  ;;  %s2305_s22 = scalar_lea.vmem %s2751_s7, 2048 }
  0x6e   : > { %1957 = vmatprep.subr.bf16.mxu0 %v1956_v3  ;;  %v1964_v8 = vpack.c.bf16 %v257_v7, %v256_v6  ;;  %v259_v11 = vld [vmem:[#allocation7 + $0x38] sm:$0xff]  ;;  %1652 = vmatprep.mubr.f32.mxu0 %v236_v9  ;;  %v260_v13 = vld [vmem:[#allocation7 + $0x40] sm:$0xff]  ;;  %v261_v14 = vld [vmem:[#allocation7 + $0x48] sm:$0xff]  ;;  %p2306_p2 = scmp.ne.s32.totalorder %s2751_s7, %s2305_s22  ;;  %s2382_s5 = smov [#allocation8]  }
  0x6f   : > { %1959 = vmatpush3.bf16.msra.mxu0 %v1956_v3  ;;  %v1968_v12 = vpack.c.bf16 %v259_v11, %v258_v10  ;;  %v1972_v15 = vpack.c.bf16 %v261_v14, %v260_v13  ;;  %v262_v16 = vld [vmem:[#allocation7 + $0x50] sm:$0xff]  ;;  %v263_v17 = vld [vmem:[#allocation7 + $0x58] sm:$0xff]  ;;  %v264_v19 = vld [vmem:[#allocation7 + $0x60] sm:$0xff]  ;;  %s2309_s11 = sshll.u32 %s2382_s5, 4  ;;  %s2310_s11 = int_to_ptr.vmem [resolvable:$false] %s2309_s11 }
  0x70   : > { %1961 = vmatprep.subr.bf16.mxu0 %v1960_v5  ;;  %v1976_v18 = vpack.c.bf16 %v263_v17, %v262_v16  ;;  %v265_v20 = vld [vmem:[#allocation7 + $0x68] sm:$0xff]  ;;  %v266_v22 = vld [vmem:[#allocation7 + $0x70] sm:$0xff]  ;;  %v267_v23 = vld [vmem:[#allocation7 + $0x78] sm:$0xff]  ;;  %p2307_p4 = pnand %p2306_p2, %p2523_p6  ;;  %s2311_s25 = scalar_lea.vmem %s2310_s11, 4096 }
  0x71   : > { %v1980_v21 = vpack.c.bf16 %v265_v20, %v264_v19  ;;  %v1984_v24 = vpack.c.bf16 %v267_v23, %v266_v22  ;;  %v237_v25 = vld [vmem:[%s2584_s28 + $0x8] sm:$0xff]  ;;  %v238_v26 = vld [vmem:[%s2584_s28 + $0x10] sm:$0xff]  ;;  %v239_v27 = vld [vmem:[%s2584_s28 + $0x18] sm:$0xff]  ;;  %p2312_p11 = scmp.lt.s32.totalorder %s2751_s7, %s2310_s11  ;;  %p2313_p13 = scmp.lt.s32.totalorder %s2311_s25, %s2305_s22 }
  0x72   : > { %v240_v28 = vld [vmem:[%s2584_s28 + $0x20] sm:$0xff]  ;;  %v241_v29 = vld [vmem:[%s2584_s28 + $0x28] sm:$0xff]  ;;  %v242_v30 = vld [vmem:[%s2584_s28 + $0x30] sm:$0xff]  ;;  %p2308_p8 = pneg %p2307_p4 }
  0x73   : > { %1963 = vmatpush3.bf16.msra.mxu0 %v1960_v5  ;;  %v243_v31 = vld [vmem:[%s2584_s28 + $0x38] sm:$0xff]  ;;  %v244_v32 = vld [vmem:[%s2584_s28 + $0x40] sm:$0xff]  ;;  %v245_v33 = vld [vmem:[%s2584_s28 + $0x48] sm:$0xff]  ;;  %p2314_p3 = por %p2313_p13, %p2312_p11 }
  0x74   : > { %1965 = vmatprep.subr.bf16.mxu0 %v1964_v8  ;;  %v246_v34 = vld [vmem:[%s2584_s28 + $0x50] sm:$0xff]  ;;  %v247_v35 = vld [vmem:[%s2584_s28 + $0x58] sm:$0xff]  ;;  %v248_v36 = vld [vmem:[%s2584_s28 + $0x60] sm:$0xff] }
  0x75   : > { %v249_v37 = vld [vmem:[%s2584_s28 + $0x68] sm:$0xff]  ;;  %v250_v38 = vld [vmem:[%s2584_s28 + $0x70] sm:$0xff]  ;;  %v251_v39 = vld [vmem:[%s2584_s28 + $0x78] sm:$0xff]  ;;  %p2315_p7 = pnand %p2314_p3, %p2308_p8 }
  0x76   : > { %v2610_v40 = vld [vmem:[#allocation5] sm:$0xff]  ;;  %v612_v41 = vld [vmem:[#allocation7 + $0x88] sm:$0xff]  ;;  %v613_v42 = vld [vmem:[#allocation7 + $0x90] sm:$0xff] }
  0x77   : > { %1967 = vmatpush3.bf16.msra.mxu0 %v1964_v8  ;;  %1708 = vmatprep.mubr.f32.mxu1 %v2610_v40  ;;  %v614_v43 = vld [vmem:[#allocation7 + $0x98] sm:$0xff]  ;;  %v2020_v44 = vpack.c.bf16 %v613_v42, %v612_v41  ;;  %v615_v45 = vld [vmem:[#allocation7 + $0xa0] sm:$0xff]  ;;  %v616_v47 = vld [vmem:[#allocation7 + $0xa8] sm:$0xff] }
  0x78   : > { %1969 = vmatprep.subr.bf16.mxu0 %v1968_v12  ;;  %v2024_v46 = vpack.c.bf16 %v615_v45, %v614_v43  ;;  %v617_v48 = vld [vmem:[#allocation7 + $0xb0] sm:$0xff]  ;;  %v618_v50 = vld [vmem:[#allocation7 + $0xb8] sm:$0xff]  ;;  %v619_v51 = vld [vmem:[#allocation7 + $0xc0] sm:$0xff] }
  0x79   : > { %v2028_v49 = vpack.c.bf16 %v617_v48, %v616_v47  ;;  %v2032_v52 = vpack.c.bf16 %v619_v51, %v618_v50  ;;  %v620_v53 = vld [vmem:[#allocation7 + $0xc8] sm:$0xff]  ;;  %v621_v54 = vld [vmem:[#allocation7 + $0xd0] sm:$0xff]  ;;  %v622_v56 = vld [vmem:[#allocation7 + $0xd8] sm:$0xff] }
  0x7a   : > { %v2036_v55 = vpack.c.bf16 %v621_v54, %v620_v53  ;;  %v623_v57 = vld [vmem:[#allocation7 + $0xe0] sm:$0xff]  ;;  %v2613_v19 = vld [vmem:[#allocation5 + $0x8] sm:$0xff]  ;;  %v2615_v20 = vld [vmem:[#allocation5 + $0x10] sm:$0xff] }
  0x7b   : > { %1971 = vmatpush3.bf16.msra.mxu0 %v1968_v12  ;;  %v2040_v58 = vpack.c.bf16 %v623_v57, %v622_v56  ;;  %v2621_v22 = vld [vmem:[#allocation5 + $0x20] sm:$0xff]  ;;  %v2625_v23 = vld [vmem:[#allocation5 + $0x28] sm:$0xff] }
  0x7c   : > { %1973 = vmatprep.subr.bf16.mxu0 %v1972_v15  ;;  %v2659_v41 = vld [vmem:[#allocation7 + $0x80] ss:$0 sm:$0xff] }
  0x7f   : > { %1975 = vmatpush3.bf16.msra.mxu0 %v1972_v15 }
  0x80   : > { %1977 = vmatprep.subr.bf16.mxu0 %v1976_v18 }
  0x83   : > { %1979 = vmatpush3.bf16.msra.mxu0 %v1976_v18 }
  0x84   : > { %1981 = vmatprep.subr.bf16.mxu0 %v1980_v21 }
  0x87   : > { %1983 = vmatpush3.bf16.msra.mxu0 %v1980_v21  ;;  %v2619_v21 = vld [vmem:[#allocation5 + $0x18] sm:$0xff] }
  0x88   : > { %1985 = vmatprep.subr.bf16.mxu0 %v1984_v24 }
  0x8b   : > { %1987 = vmatpush3.bf16.msra.mxu0 %v1984_v24  ;;  %v2627_v24 = vld [vmem:[#allocation5 + $0x30] sm:$0xff] }
  0x8c   : > { %2021 = vmatprep.subr.bf16.mxu0 %v2020_v44 }
  0x8e   : > { %1653 = vmatmul.mubr.f32.vlgmr.msra.gmra.mrb[0].mxu0 %v237_v25  ;;  %v2631_v25 = vld [vmem:[#allocation5 + $0x38] sm:$0xff] }
  0x8f   : > { %1655 = vmatprep.mubr.f32.mxu0 %v238_v26  ;;  %2023 = vmatpush3.bf16.msra.mxu0 %v2020_v44  ;;  %v2633_v26 = vld [vmem:[#allocation5 + $0x40] sm:$0xff] }
  0x90   : > { %2025 = vmatprep.subr.bf16.mxu0 %v2024_v46 }
  0x92   : > { %1656 = vmatmul.mubr.f32.gmra.mrb[2].mxu0 %v239_v27  ;;  %v2637_v27 = vld [vmem:[#allocation5 + $0x48] sm:$0xff] }
  0x93   : > { %1658 = vmatprep.mubr.f32.mxu0 %v240_v28  ;;  %2027 = vmatpush3.bf16.msra.mxu0 %v2024_v46  ;;  %v2639_v28 = vld [vmem:[#allocation5 + $0x50] sm:$0xff] }
  0x94   : > { %2029 = vmatprep.subr.bf16.mxu0 %v2028_v49 }
  0x96   : > { %1659 = vmatmul.mubr.f32.gmra.mrb[4].mxu0 %v241_v29  ;;  %v2643_v29 = vld [vmem:[#allocation5 + $0x58] sm:$0xff] }
  0x97   : > { %1661 = vmatprep.mubr.f32.mxu0 %v242_v30  ;;  %2031 = vmatpush3.bf16.msra.mxu0 %v2028_v49  ;;  %v2645_v30 = vld [vmem:[#allocation5 + $0x60] sm:$0xff] }
  0x98   : > { %2033 = vmatprep.subr.bf16.mxu0 %v2032_v52 }
  0x9a   : > { %1662 = vmatmul.mubr.f32.gmra.mrb[6].mxu0 %v243_v31  ;;  %v2649_v31 = vld [vmem:[#allocation5 + $0x68] sm:$0xff] }
  0x9b   : > { %1664 = vmatprep.mubr.f32.mxu0 %v244_v32  ;;  %2035 = vmatpush3.bf16.msra.mxu0 %v2032_v52  ;;  %v2651_v32 = vld [vmem:[#allocation5 + $0x70] sm:$0xff] }
  0x9c   : > { %2037 = vmatprep.subr.bf16.mxu0 %v2036_v55 }
  0x9e   : > { %1665 = vmatmul.mubr.f32.gmra.mrb[8].mxu0 %v245_v33  ;;  %v2655_v33 = vld [vmem:[#allocation5 + $0x78] sm:$0xff] }
  0x9f   : > { %1667 = vmatprep.mubr.f32.mxu0 %v246_v34  ;;  %2039 = vmatpush3.bf16.msra.mxu0 %v2036_v55  ;;  %v624_v34 = vld [vmem:[#allocation7 + $0xe8] sm:$0xff] }
  0xa0   : > { %2041 = vmatprep.subr.bf16.mxu0 %v2040_v58 }
  0xa2   : > { %1668 = vmatmul.mubr.f32.gmra.mrb[10].mxu0 %v247_v35  ;;  %v625_v35 = vld [vmem:[#allocation7 + $0xf0] sm:$0xff] }
  0xa3   : > { %1670 = vmatprep.mubr.f32.mxu0 %v248_v36  ;;  %2043 = vmatpush3.bf16.msra.mxu0 %v2040_v58  ;;  %v2044_v36 = vpack.c.bf16 %v625_v35, %v624_v34 }
  0xa5   : > { %2045 = vmatprep.subr.bf16.mxu0 %v2044_v36 }
  0xa6   : > { %1671 = vmatmul.mubr.f32.gmra.mrb[12].mxu0 %v249_v37  ;;  %v626_v37 = vld [vmem:[#allocation7 + $0xf8] sm:$0xff] }
  0xa7   : > { %1673 = vmatprep.mubr.f32.mxu0 %v250_v38  ;;  %2047 = vmatpush3.bf16.msra.mxu0 %v2044_v36  ;;  %v627_v38 = vld [vmem:[#allocation7 + $0x100] sm:$0xff] }
  0xaa   : > { %1674 = vmatmul.mubr.f32.gmra.mrb[14].mxu0 %v251_v39  ;;  %v2048_v39 = vpack.c.bf16 %v627_v38, %v626_v37 }
  0xac   : > { %2049 = vmatprep.subr.bf16.mxu0 %v2048_v39 }
  0xad   : > { %2051 = vmatpush3.bf16.msra.mxu0 %v2048_v39 }
 0x161   : > { %v1654_v59 = vpop.f32.mrb[0].mxu0 }
 0x162   : > { %v335_v60 = vpop.f32.mrb[1].mxu0 }
 0x163   : > { %v1988_v61 = vpack.c.bf16 %v1654_v59, %v335_v60 }
 0x165   : > { %v1657_v62 = vpop.f32.mrb[2].mxu0  ;;  %1989 = vmatprep.subr.bf16.mxu1 %v1988_v61 }
 0x166   : > { %v345_v63 = vpop.f32.mrb[3].mxu0  ;;  %1991 = vmatpush3.bf16.msra.mxu1 %v1988_v61 }
 0x167   : > { %v1992_v0 = vpack.c.bf16 %v1657_v62, %v345_v63 }
 0x169   : > { %v1660_v1 = vpop.f32.mrb[4].mxu0  ;;  %1993 = vmatprep.subr.bf16.mxu1 %v1992_v0 }
 0x16a   : > { %v355_v2 = vpop.f32.mrb[5].mxu0  ;;  %1995 = vmatpush3.bf16.msra.mxu1 %v1992_v0 }
 0x16b   : > { %v1996_v3 = vpack.c.bf16 %v1660_v1, %v355_v2 }
 0x16d   : > { %v1663_v4 = vpop.f32.mrb[6].mxu0  ;;  %1997 = vmatprep.subr.bf16.mxu1 %v1996_v3 }
 0x16e   : > { %v365_v5 = vpop.f32.mrb[7].mxu0  ;;  %1999 = vmatpush3.bf16.msra.mxu1 %v1996_v3 }
 0x16f   : > { %v2000_v6 = vpack.c.bf16 %v1663_v4, %v365_v5 }
 0x171   : > { %v1666_v7 = vpop.f32.mrb[8].mxu0  ;;  %2001 = vmatprep.subr.bf16.mxu1 %v2000_v6 }
 0x172   : > { %v375_v8 = vpop.f32.mrb[9].mxu0  ;;  %2003 = vmatpush3.bf16.msra.mxu1 %v2000_v6 }
 0x173   : > { %v2004_v9 = vpack.c.bf16 %v1666_v7, %v375_v8 }
 0x175   : > { %v1669_v10 = vpop.f32.mrb[10].mxu0  ;;  %2005 = vmatprep.subr.bf16.mxu1 %v2004_v9 }
 0x176   : > { %v385_v11 = vpop.f32.mrb[11].mxu0  ;;  %2007 = vmatpush3.bf16.msra.mxu1 %v2004_v9 }
 0x177   : > { %v2008_v12 = vpack.c.bf16 %v1669_v10, %v385_v11 }
 0x179   : > { %v1672_v13 = vpop.f32.mrb[12].mxu0  ;;  %2009 = vmatprep.subr.bf16.mxu1 %v2008_v12 }
 0x17a   : > { %v395_v14 = vpop.f32.mrb[13].mxu0  ;;  %2011 = vmatpush3.bf16.msra.mxu1 %v2008_v12 }
 0x17b   : > { %v2012_v15 = vpack.c.bf16 %v1672_v13, %v395_v14 }
 0x17d   : > { %v1675_v16 = vpop.f32.mrb[14].mxu0  ;;  %2013 = vmatprep.subr.bf16.mxu1 %v2012_v15 }
 0x17e   : > { %v405_v17 = vpop.f32.mrb[15].mxu0  ;;  %2015 = vmatpush3.bf16.msra.mxu1 %v2012_v15 }
 0x17f   : > { %v2016_v18 = vpack.c.bf16 %v1675_v16, %v405_v17 }
 0x181   : > { %2017 = vmatprep.subr.bf16.mxu1 %v2016_v18 }
 0x182   : > { %2019 = vmatpush3.bf16.msra.mxu1 %v2016_v18 }
 0x185   : > { %1709 = vmatmul.mubr.f32.vlgmr.msra.gmra.mrb[0].mxu1 %v2613_v19 }
 0x186   : > { %1711 = vmatprep.mubr.f32.mxu1 %v2615_v20 }
 0x189   : > { %1712 = vmatmul.mubr.f32.gmra.mrb[2].mxu1 %v2619_v21 }
 0x18a   : > { %1714 = vmatprep.mubr.f32.mxu1 %v2621_v22 }
 0x18d   : > { %1715 = vmatmul.mubr.f32.gmra.mrb[4].mxu1 %v2625_v23 }
 0x18e   : > { %1717 = vmatprep.mubr.f32.mxu1 %v2627_v24 }
 0x191   : > { %1718 = vmatmul.mubr.f32.gmra.mrb[6].mxu1 %v2631_v25 }
 0x192   : > { %1720 = vmatprep.mubr.f32.mxu1 %v2633_v26 }
 0x195   : > { %1721 = vmatmul.mubr.f32.gmra.mrb[8].mxu1 %v2637_v27 }
 0x196   : > { %1723 = vmatprep.mubr.f32.mxu1 %v2639_v28 }
 0x199   : > { %1724 = vmatmul.mubr.f32.gmra.mrb[10].mxu1 %v2643_v29 }
 0x19a   : > { %1726 = vmatprep.mubr.f32.mxu1 %v2645_v30 }
 0x19d   : > { %1727 = vmatmul.mubr.f32.gmra.mrb[12].mxu1 %v2649_v31 }
 0x19e   : > { %1729 = vmatprep.mubr.f32.mxu1 %v2651_v32 }
 0x1a1   : > { %1730 = vmatmul.mubr.f32.gmra.mrb[14].mxu1 %v2655_v33 }
 0x1a2   : > { %1820 = vmatprep.mubr.f32.mxu1 %v2610_v40 }
 0x258   : > { %v1710_v42 = vpop.f32.mrb[0].mxu1 }
 0x259   : > { %v490_v43 = vadd.f32 %v1710_v42, %v2659_v41  ;;  %v484_v44 = vpop.f32.mrb[1].mxu1 }
 0x25a   : > { %v485_v45 = vadd.f32 %v2659_v41, %v484_v44 }
 0x25b   : > { %v580_v46 = vmul.f32 0.2, %v490_v43  ;;  %vm564_vm0 = vcmp.gt.f32.partialorder %v490_v43, 0.0 }
 0x25c   : > { %v579_v47 = vmul.f32 0.2, %v485_v45  ;;  %v1713_v48 = vpop.f32.mrb[2].mxu1  ;;  %vm563_vm1 = vcmp.gt.f32.partialorder %v485_v45, 0.0 }
 0x25d   : > { %v500_v49 = vadd.f32 %v1713_v48, %v2659_v41  ;;  %v494_v50 = vpop.f32.mrb[3].mxu1  ;;  %v596_v53 = vsel %vm564_vm0, %v490_v43, %v580_v46 }
 0x25e   : > { %v495_v51 = vadd.f32 %v2659_v41, %v494_v50  ;;  %v595_v52 = vsel %vm563_vm1, %v485_v45, %v579_v47 }
 0x25f   : > { %v582_v54 = vmul.f32 0.2, %v500_v49  ;;  %1764 = vmatprep.mubr.f32.mxu0 %v595_v52  ;;  %vm566_vm3 = vcmp.gt.f32.partialorder %v500_v49, 0.0 }
 0x260   : > { %v581_v55 = vmul.f32 0.2, %v495_v51  ;;  %v1716_v56 = vpop.f32.mrb[4].mxu1  ;;  %1765 = vmatmul.mubr.f32.vlgmr.msra.gmra.mrb[16].mxu0 %v596_v53  ;;  %vm565_vm2 = vcmp.gt.f32.partialorder %v495_v51, 0.0 }
 0x261   : > { %v510_v57 = vadd.f32 %v1716_v56, %v2659_v41  ;;  %v504_v58 = vpop.f32.mrb[5].mxu1  ;;  %v598_v62 = vsel %vm566_vm3, %v500_v49, %v582_v54 }
 0x262   : > { %v505_v59 = vadd.f32 %v2659_v41, %v504_v58  ;;  %v597_v60 = vsel %vm565_vm2, %v495_v51, %v581_v55 }
 0x263   : > { %v584_v61 = vmul.f32 0.2, %v510_v57  ;;  %1767 = vmatprep.mubr.f32.mxu0 %v597_v60  ;;  %vm568_vm5 = vcmp.gt.f32.partialorder %v510_v57, 0.0  ;;  %v973_v60 = vld [vmem:[#allocation7 + $0x118] sm:$0xff] }
 0x264   : > { %v583_v63 = vmul.f32 0.2, %v505_v59  ;;  %v1719_v0 = vpop.f32.mrb[6].mxu1  ;;  %1768 = vmatmul.mubr.f32.gmra.mrb[18].mxu0 %v598_v62  ;;  %vm567_vm4 = vcmp.gt.f32.partialorder %v505_v59, 0.0 }
 0x265   : > { %v520_v1 = vadd.f32 %v1719_v0, %v2659_v41  ;;  %v514_v2 = vpop.f32.mrb[7].mxu1  ;;  %v600_v6 = vsel %vm568_vm5, %v510_v57, %v584_v61  ;;  %v974_v61 = vld [vmem:[#allocation7 + $0x120] sm:$0xff] }
 0x266   : > { %v515_v3 = vadd.f32 %v2659_v41, %v514_v2  ;;  %v599_v4 = vsel %vm567_vm4, %v505_v59, %v583_v63  ;;  %v972_v59 = vld [vmem:[#allocation7 + $0x110] sm:$0xff]  ;;  %v975_v63 = vld [vmem:[#allocation7 + $0x128] sm:$0xff] }
 0x267   : > { %v586_v5 = vmul.f32 0.2, %v520_v1  ;;  %1770 = vmatprep.mubr.f32.mxu0 %v599_v4  ;;  %vm570_vm7 = vcmp.gt.f32.partialorder %v520_v1, 0.0  ;;  %v2084_v62 = vpack.c.bf16 %v973_v60, %v972_v59  ;;  %v2088_v0 = vpack.c.bf16 %v975_v63, %v974_v61  ;;  %v979_v4 = vld [vmem:[#allocation7 + $0x148] sm:$0xff] }
 0x268   : > { %v585_v7 = vmul.f32 0.2, %v515_v3  ;;  %v1722_v8 = vpop.f32.mrb[8].mxu1  ;;  %1771 = vmatmul.mubr.f32.gmra.mrb[20].mxu0 %v600_v6  ;;  %vm569_vm6 = vcmp.gt.f32.partialorder %v515_v3, 0.0  ;;  %v980_v6 = vld [vmem:[#allocation7 + $0x150] sm:$0xff] }
 0x269   : > { %v530_v9 = vadd.f32 %v1722_v8, %v2659_v41  ;;  %v524_v10 = vpop.f32.mrb[9].mxu1  ;;  %v602_v14 = vsel %vm570_vm7, %v520_v1, %v586_v5  ;;  %v976_v1 = vld [vmem:[#allocation7 + $0x130] sm:$0xff]  ;;  %2085 = vmatprep.subr.bf16.mxu0 %v2084_v62  ;;  %v2693_v59 = vld [vmem:[#allocation7 + $0x108] ss:$0 sm:$0xff] }
 0x26a   : > { %v525_v11 = vadd.f32 %v2659_v41, %v524_v10  ;;  %v601_v12 = vsel %vm569_vm6, %v515_v3, %v585_v7  ;;  %2087 = vmatpush3.bf16.msra.mxu0 %v2084_v62  ;;  %v978_v3 = vld [vmem:[#allocation7 + $0x140] sm:$0xff]  ;;  %v981_v7 = vld [vmem:[#allocation7 + $0x158] sm:$0xff]  ;;  %v983_v10 = vld [vmem:[#allocation7 + $0x168] sm:$0xff] }
 0x26b   : > { %v588_v13 = vmul.f32 0.2, %v530_v9  ;;  %1773 = vmatprep.mubr.f32.mxu0 %v601_v12  ;;  %vm572_vm9 = vcmp.gt.f32.partialorder %v530_v9, 0.0  ;;  %2089 = vmatprep.subr.bf16.mxu0 %v2088_v0  ;;  %v2096_v5 = vpack.c.bf16 %v979_v4, %v978_v3  ;;  %v2100_v8 = vpack.c.bf16 %v981_v7, %v980_v6 }
 0x26c   : > { %v587_v15 = vmul.f32 0.2, %v525_v11  ;;  %v1725_v16 = vpop.f32.mrb[10].mxu1  ;;  %1774 = vmatmul.mubr.f32.gmra.mrb[22].mxu0 %v602_v14  ;;  %vm571_vm8 = vcmp.gt.f32.partialorder %v525_v11, 0.0 }
 0x26d   : > { %v540_v17 = vadd.f32 %v1725_v16, %v2659_v41  ;;  %v534_v18 = vpop.f32.mrb[11].mxu1  ;;  %v604_v37 = vsel %vm572_vm9, %v530_v9, %v588_v13  ;;  %v982_v9 = vld [vmem:[#allocation7 + $0x160] sm:$0xff] }
 0x26e   : > { %v535_v34 = vadd.f32 %v2659_v41, %v534_v18  ;;  %v603_v35 = vsel %vm571_vm8, %v525_v11, %v587_v15  ;;  %2091 = vmatpush3.bf16.msra.mxu0 %v2088_v0  ;;  %v2104_v11 = vpack.c.bf16 %v983_v10, %v982_v9 }
 0x26f   : > { %v590_v36 = vmul.f32 0.2, %v540_v17  ;;  %1776 = vmatprep.mubr.f32.mxu0 %v603_v35  ;;  %vm574_vm11 = vcmp.gt.f32.partialorder %v540_v17, 0.0 }
 0x270   : > { %v589_v38 = vmul.f32 0.2, %v535_v34  ;;  %v1728_v39 = vpop.f32.mrb[12].mxu1  ;;  %1777 = vmatmul.mubr.f32.gmra.mrb[24].mxu0 %v604_v37  ;;  %vm573_vm10 = vcmp.gt.f32.partialorder %v535_v34, 0.0 }
 0x271   : > { %v550_v42 = vadd.f32 %v1728_v39, %v2659_v41  ;;  %v544_v43 = vpop.f32.mrb[13].mxu1  ;;  %v606_v47 = vsel %vm574_vm11, %v540_v17, %v590_v36 }
 0x272   : > { %v545_v44 = vadd.f32 %v2659_v41, %v544_v43  ;;  %v605_v45 = vsel %vm573_vm10, %v535_v34, %v589_v38 }
 0x273   : > { %v592_v46 = vmul.f32 0.2, %v550_v42  ;;  %1779 = vmatprep.mubr.f32.mxu0 %v605_v45  ;;  %vm576_vm13 = vcmp.gt.f32.partialorder %v550_v42, 0.0 }
 0x274   : > { %v591_v48 = vmul.f32 0.2, %v545_v44  ;;  %v1731_v49 = vpop.f32.mrb[14].mxu1  ;;  %1780 = vmatmul.mubr.f32.gmra.mrb[26].mxu0 %v606_v47  ;;  %vm575_vm12 = vcmp.gt.f32.partialorder %v545_v44, 0.0 }
 0x275   : > { %v560_v50 = vadd.f32 %v1731_v49, %v2659_v41  ;;  %v554_v51 = vpop.f32.mrb[15].mxu1  ;;  %v608_v55 = vsel %vm576_vm13, %v550_v42, %v592_v46 }
 0x276   : > { %v555_v52 = vadd.f32 %v2659_v41, %v554_v51  ;;  %v607_v53 = vsel %vm575_vm12, %v545_v44, %v591_v48  ;;  %v977_v41 = vld [vmem:[#allocation7 + $0x138] sm:$0xff] }
 0x277   : > { %v594_v54 = vmul.f32 0.2, %v560_v50  ;;  %1782 = vmatprep.mubr.f32.mxu0 %v607_v53  ;;  %vm578_vm15 = vcmp.gt.f32.partialorder %v560_v50, 0.0  ;;  %v2092_v2 = vpack.c.bf16 %v977_v41, %v976_v1  ;;  %v984_v53 = vld [vmem:[#allocation7 + $0x170] sm:$0xff] }
 0x278   : > { %v593_v56 = vmul.f32 0.2, %v555_v52  ;;  %1783 = vmatmul.mubr.f32.gmra.mrb[28].mxu0 %v608_v55  ;;  %vm577_vm14 = vcmp.gt.f32.partialorder %v555_v52, 0.0 }
 0x279   : > { %v610_v58 = vsel %vm578_vm15, %v560_v50, %v594_v54  ;;  %2093 = vmatprep.subr.bf16.mxu0 %v2092_v2  ;;  %v985_v54 = vld [vmem:[#allocation7 + $0x178] sm:$0xff] }
 0x27a   : > { %v609_v57 = vsel %vm577_vm14, %v555_v52, %v593_v56  ;;  %2095 = vmatpush3.bf16.msra.mxu0 %v2092_v2  ;;  %v2108_v55 = vpack.c.bf16 %v985_v54, %v984_v53  ;;  %v986_v56 = vld [vmem:[#allocation7 + $0x180] sm:$0xff] }
 0x27b   : > { %1785 = vmatprep.mubr.f32.mxu0 %v609_v57  ;;  %2097 = vmatprep.subr.bf16.mxu0 %v2096_v5  ;;  %v987_v57 = vld [vmem:[#allocation7 + $0x188] sm:$0xff] }
 0x27c   : > { %1786 = vmatmul.mubr.f32.gmra.mrb[30].mxu0 %v610_v58  ;;  %v2112_v58 = vpack.c.bf16 %v987_v57, %v986_v56 }
 0x27e   : > { %2099 = vmatpush3.bf16.msra.mxu0 %v2096_v5 }
 0x27f   : > { %2101 = vmatprep.subr.bf16.mxu0 %v2100_v8 }
 0x282   : > { %2103 = vmatpush3.bf16.msra.mxu0 %v2100_v8 }
 0x283   : > { %2105 = vmatprep.subr.bf16.mxu0 %v2104_v11 }
 0x286   : > { %2107 = vmatpush3.bf16.msra.mxu0 %v2104_v11 }
 0x287   : > { %2109 = vmatprep.subr.bf16.mxu0 %v2108_v55 }
 0x28a   : > { %2111 = vmatpush3.bf16.msra.mxu0 %v2108_v55 }
 0x28b   : > { %2113 = vmatprep.subr.bf16.mxu0 %v2112_v58 }
 0x28e   : > { %2115 = vmatpush3.bf16.msra.mxu0 %v2112_v58 }
 0x333   : > { %v1766_v12 = vpop.f32.mrb[16].mxu0 }
 0x334   : > { %v695_v13 = vpop.f32.mrb[17].mxu0 }
 0x335   : > { %v2052_v14 = vpack.c.bf16 %v1766_v12, %v695_v13 }
 0x337   : > { %v1769_v15 = vpop.f32.mrb[18].mxu0  ;;  %2053 = vmatprep.subr.bf16.mxu1 %v2052_v14 }
 0x338   : > { %v705_v16 = vpop.f32.mrb[19].mxu0  ;;  %2055 = vmatpush3.bf16.msra.mxu1 %v2052_v14 }
 0x339   : > { %v2056_v17 = vpack.c.bf16 %v1769_v15, %v705_v16 }
 0x33b   : > { %v1772_v18 = vpop.f32.mrb[20].mxu0  ;;  %2057 = vmatprep.subr.bf16.mxu1 %v2056_v17 }
 0x33c   : > { %v715_v34 = vpop.f32.mrb[21].mxu0  ;;  %2059 = vmatpush3.bf16.msra.mxu1 %v2056_v17 }
 0x33d   : > { %v2060_v35 = vpack.c.bf16 %v1772_v18, %v715_v34 }
 0x33f   : > { %v1775_v36 = vpop.f32.mrb[22].mxu0  ;;  %2061 = vmatprep.subr.bf16.mxu1 %v2060_v35 }
 0x340   : > { %v725_v37 = vpop.f32.mrb[23].mxu0  ;;  %2063 = vmatpush3.bf16.msra.mxu1 %v2060_v35 }
 0x341   : > { %v2064_v38 = vpack.c.bf16 %v1775_v36, %v725_v37 }
 0x343   : > { %v1778_v39 = vpop.f32.mrb[24].mxu0  ;;  %2065 = vmatprep.subr.bf16.mxu1 %v2064_v38 }
 0x344   : > { %v735_v42 = vpop.f32.mrb[25].mxu0  ;;  %2067 = vmatpush3.bf16.msra.mxu1 %v2064_v38 }
 0x345   : > { %v2068_v43 = vpack.c.bf16 %v1778_v39, %v735_v42 }
 0x347   : > { %v1781_v44 = vpop.f32.mrb[26].mxu0  ;;  %2069 = vmatprep.subr.bf16.mxu1 %v2068_v43 }
 0x348   : > { %v745_v45 = vpop.f32.mrb[27].mxu0  ;;  %2071 = vmatpush3.bf16.msra.mxu1 %v2068_v43 }
 0x349   : > { %v2072_v46 = vpack.c.bf16 %v1781_v44, %v745_v45 }
 0x34b   : > { %v1784_v47 = vpop.f32.mrb[28].mxu0  ;;  %2073 = vmatprep.subr.bf16.mxu1 %v2072_v46 }
 0x34c   : > { %v755_v48 = vpop.f32.mrb[29].mxu0  ;;  %2075 = vmatpush3.bf16.msra.mxu1 %v2072_v46 }
 0x34d   : > { %v2076_v49 = vpack.c.bf16 %v1784_v47, %v755_v48 }
 0x34f   : > { %v1787_v50 = vpop.f32.mrb[30].mxu0  ;;  %2077 = vmatprep.subr.bf16.mxu1 %v2076_v49 }
 0x350   : > { %v765_v51 = vpop.f32.mrb[31].mxu0  ;;  %2079 = vmatpush3.bf16.msra.mxu1 %v2076_v49 }
 0x351   : > { %v2080_v52 = vpack.c.bf16 %v1787_v50, %v765_v51 }
 0x353   : > { %2081 = vmatprep.subr.bf16.mxu1 %v2080_v52 }
 0x354   : > { %2083 = vmatpush3.bf16.msra.mxu1 %v2080_v52 }
 0x357   : > { %1821 = vmatmul.mubr.f32.vlgmr.msra.gmra.mrb[16].mxu1 %v2613_v19 }
 0x358   : > { %1823 = vmatprep.mubr.f32.mxu1 %v2615_v20 }
 0x35b   : > { %1824 = vmatmul.mubr.f32.gmra.mrb[18].mxu1 %v2619_v21 }
 0x35c   : > { %1826 = vmatprep.mubr.f32.mxu1 %v2621_v22 }
 0x35f   : > { %1827 = vmatmul.mubr.f32.gmra.mrb[20].mxu1 %v2625_v23 }
 0x360   : > { %1829 = vmatprep.mubr.f32.mxu1 %v2627_v24 }
 0x363   : > { %1830 = vmatmul.mubr.f32.gmra.mrb[22].mxu1 %v2631_v25 }
 0x364   : > { %1832 = vmatprep.mubr.f32.mxu1 %v2633_v26 }
 0x367   : > { %1833 = vmatmul.mubr.f32.gmra.mrb[24].mxu1 %v2637_v27 }
 0x368   : > { %1835 = vmatprep.mubr.f32.mxu1 %v2639_v28 }
 0x36b   : > { %1836 = vmatmul.mubr.f32.gmra.mrb[26].mxu1 %v2643_v29 }
 0x36c   : > { %1838 = vmatprep.mubr.f32.mxu1 %v2645_v30 }
 0x36f   : > { %1839 = vmatmul.mubr.f32.gmra.mrb[28].mxu1 %v2649_v31 }
 0x370   : > { %1841 = vmatprep.mubr.f32.mxu1 %v2651_v32 }
 0x373   : > { %1842 = vmatmul.mubr.f32.gmra.mrb[30].mxu1 %v2655_v33 }
 0x374   : > { %1932 = vmatprep.mubr.f32.mxu1 %v2610_v40 }
 0x42a   : > { %v1822_v60 = vpop.f32.mrb[16].mxu1 }
 0x42b   : > { %v850_v61 = vadd.f32 %v1822_v60, %v2693_v59  ;;  %v844_v62 = vpop.f32.mrb[17].mxu1 }
 0x42c   : > { %v845_v63 = vadd.f32 %v2693_v59, %v844_v62 }
 0x42d   : > { %v940_v0 = vmul.f32 0.2, %v850_v61  ;;  %vm924_vm0 = vcmp.gt.f32.partialorder %v850_v61, 0.0 }
 0x42e   : > { %v939_v40 = vmul.f32 0.2, %v845_v63  ;;  %v1825_v1 = vpop.f32.mrb[18].mxu1  ;;  %vm923_vm1 = vcmp.gt.f32.partialorder %v845_v63, 0.0 }
 0x42f   : > { %v860_v41 = vadd.f32 %v1825_v1, %v2693_v59  ;;  %v854_v2 = vpop.f32.mrb[19].mxu1  ;;  %v956_v5 = vsel %vm924_vm0, %v850_v61, %v940_v0 }
 0x430   : > { %v855_v3 = vadd.f32 %v2693_v59, %v854_v2  ;;  %v955_v4 = vsel %vm923_vm1, %v845_v63, %v939_v40 }
 0x431   : > { %v942_v6 = vmul.f32 0.2, %v860_v41  ;;  %1876 = vmatprep.mubr.f32.mxu0 %v955_v4  ;;  %vm926_vm3 = vcmp.gt.f32.partialorder %v860_v41, 0.0 }
 0x432   : > { %v941_v7 = vmul.f32 0.2, %v855_v3  ;;  %v1828_v8 = vpop.f32.mrb[20].mxu1  ;;  %1877 = vmatmul.mubr.f32.vlgmr.msra.gmra.mrb[32].mxu0 %v956_v5  ;;  %vm925_vm2 = vcmp.gt.f32.partialorder %v855_v3, 0.0 }
 0x433   : > { %v870_v9 = vadd.f32 %v1828_v8, %v2693_v59  ;;  %v864_v10 = vpop.f32.mrb[21].mxu1  ;;  %v958_v14 = vsel %vm926_vm3, %v860_v41, %v942_v6 }
 0x434   : > { %v865_v11 = vadd.f32 %v2693_v59, %v864_v10  ;;  %v957_v12 = vsel %vm925_vm2, %v855_v3, %v941_v7 }
 0x435   : > { %v944_v13 = vmul.f32 0.2, %v870_v9  ;;  %1879 = vmatprep.mubr.f32.mxu0 %v957_v12  ;;  %vm928_vm5 = vcmp.gt.f32.partialorder %v870_v9, 0.0 }
 0x436   : > { %v943_v15 = vmul.f32 0.2, %v865_v11  ;;  %v1831_v16 = vpop.f32.mrb[22].mxu1  ;;  %1880 = vmatmul.mubr.f32.gmra.mrb[34].mxu0 %v958_v14  ;;  %vm927_vm4 = vcmp.gt.f32.partialorder %v865_v11, 0.0 }
 0x437   : > { %v880_v17 = vadd.f32 %v1831_v16, %v2693_v59  ;;  %v874_v18 = vpop.f32.mrb[23].mxu1  ;;  %v960_v37 = vsel %vm928_vm5, %v870_v9, %v944_v13 }
 0x438   : > { %v875_v34 = vadd.f32 %v2693_v59, %v874_v18  ;;  %v959_v35 = vsel %vm927_vm4, %v865_v11, %v943_v15 }
 0x439   : > { %v946_v36 = vmul.f32 0.2, %v880_v17  ;;  %1882 = vmatprep.mubr.f32.mxu0 %v959_v35  ;;  %vm930_vm7 = vcmp.gt.f32.partialorder %v880_v17, 0.0 }
 0x43a   : > { %v945_v38 = vmul.f32 0.2, %v875_v34  ;;  %v1834_v39 = vpop.f32.mrb[24].mxu1  ;;  %1883 = vmatmul.mubr.f32.gmra.mrb[36].mxu0 %v960_v37  ;;  %vm929_vm6 = vcmp.gt.f32.partialorder %v875_v34, 0.0 }
 0x43b   : > { %v890_v42 = vadd.f32 %v1834_v39, %v2693_v59  ;;  %v884_v43 = vpop.f32.mrb[25].mxu1  ;;  %v962_v47 = vsel %vm930_vm7, %v880_v17, %v946_v36 }
 0x43c   : > { %v885_v44 = vadd.f32 %v2693_v59, %v884_v43  ;;  %v961_v45 = vsel %vm929_vm6, %v875_v34, %v945_v38 }
 0x43d   : > { %v948_v46 = vmul.f32 0.2, %v890_v42  ;;  %1885 = vmatprep.mubr.f32.mxu0 %v961_v45  ;;  %vm932_vm9 = vcmp.gt.f32.partialorder %v890_v42, 0.0 }
 0x43e   : > { %v947_v48 = vmul.f32 0.2, %v885_v44  ;;  %v1837_v49 = vpop.f32.mrb[26].mxu1  ;;  %1886 = vmatmul.mubr.f32.gmra.mrb[38].mxu0 %v962_v47  ;;  %vm931_vm8 = vcmp.gt.f32.partialorder %v885_v44, 0.0 }
 0x43f   : > { %v900_v50 = vadd.f32 %v1837_v49, %v2693_v59  ;;  %v894_v51 = vpop.f32.mrb[27].mxu1  ;;  %v964_v55 = vsel %vm932_vm9, %v890_v42, %v948_v46 }
 0x440   : > { %v895_v52 = vadd.f32 %v2693_v59, %v894_v51  ;;  %v963_v53 = vsel %vm931_vm8, %v885_v44, %v947_v48 }
 0x441   : > { %v950_v54 = vmul.f32 0.2, %v900_v50  ;;  %1888 = vmatprep.mubr.f32.mxu0 %v963_v53  ;;  %vm934_vm11 = vcmp.gt.f32.partialorder %v900_v50, 0.0 }
 0x442   : > { %v949_v56 = vmul.f32 0.2, %v895_v52  ;;  %v1840_v57 = vpop.f32.mrb[28].mxu1  ;;  %1889 = vmatmul.mubr.f32.gmra.mrb[40].mxu0 %v964_v55  ;;  %vm933_vm10 = vcmp.gt.f32.partialorder %v895_v52, 0.0 }
 0x443   : > { %v910_v58 = vadd.f32 %v1840_v57, %v2693_v59  ;;  %v904_v60 = vpop.f32.mrb[29].mxu1  ;;  %v966_v0 = vsel %vm934_vm11, %v900_v50, %v950_v54 }
 0x444   : > { %v905_v61 = vadd.f32 %v2693_v59, %v904_v60  ;;  %v965_v62 = vsel %vm933_vm10, %v895_v52, %v949_v56 }
 0x445   : > { %v952_v63 = vmul.f32 0.2, %v910_v58  ;;  %1891 = vmatprep.mubr.f32.mxu0 %v965_v62  ;;  %vm936_vm13 = vcmp.gt.f32.partialorder %v910_v58, 0.0 }
 0x446   : > { %v951_v40 = vmul.f32 0.2, %v905_v61  ;;  %v1843_v1 = vpop.f32.mrb[30].mxu1  ;;  %1892 = vmatmul.mubr.f32.gmra.mrb[42].mxu0 %v966_v0  ;;  %vm935_vm12 = vcmp.gt.f32.partialorder %v905_v61, 0.0 }
 0x447   : > { %v920_v41 = vadd.f32 %v1843_v1, %v2693_v59  ;;  %v914_v2 = vpop.f32.mrb[31].mxu1  ;;  %v968_v6 = vsel %vm936_vm13, %v910_v58, %v952_v63 }
 0x448   : > { %v915_v3 = vadd.f32 %v2693_v59, %v914_v2  ;;  %v967_v4 = vsel %vm935_vm12, %v905_v61, %v951_v40 }
 0x449   : > { %v954_v5 = vmul.f32 0.2, %v920_v41  ;;  %1894 = vmatprep.mubr.f32.mxu0 %v967_v4  ;;  %vm938_vm15 = vcmp.gt.f32.partialorder %v920_v41, 0.0 }
 0x44a   : > { %v953_v7 = vmul.f32 0.2, %v915_v3  ;;  %1895 = vmatmul.mubr.f32.gmra.mrb[44].mxu0 %v968_v6  ;;  %vm937_vm14 = vcmp.gt.f32.partialorder %v915_v3, 0.0 }
 0x44b   : > { %v970_v9 = vsel %vm938_vm15, %v920_v41, %v954_v5 }
 0x44c   : > { %v969_v8 = vsel %vm937_vm14, %v915_v3, %v953_v7 }
 0x44d   : > { %1897 = vmatprep.mubr.f32.mxu0 %v969_v8 }
 0x44e   : > { %1898 = vmatmul.mubr.f32.gmra.mrb[46].mxu0 %v970_v9 }
 0x505   : > { %v1878_v10 = vpop.f32.mrb[32].mxu0 }
 0x506   : > { %v1055_v11 = vpop.f32.mrb[33].mxu0 }
 0x507   : > { %v2116_v12 = vpack.c.bf16 %v1878_v10, %v1055_v11 }
 0x509   : > { %v1881_v13 = vpop.f32.mrb[34].mxu0  ;;  %2117 = vmatprep.subr.bf16.mxu1 %v2116_v12 }
 0x50a   : > { %v1065_v14 = vpop.f32.mrb[35].mxu0  ;;  %2119 = vmatpush3.bf16.msra.mxu1 %v2116_v12 }
 0x50b   : > { %v2120_v59 = vpack.c.bf16 %v1881_v13, %v1065_v14 }
 0x50d   : > { %v1884_v15 = vpop.f32.mrb[36].mxu0  ;;  %2121 = vmatprep.subr.bf16.mxu1 %v2120_v59 }
 0x50e   : > { %v1075_v16 = vpop.f32.mrb[37].mxu0  ;;  %2123 = vmatpush3.bf16.msra.mxu1 %v2120_v59 }
 0x50f   : > { %v2124_v17 = vpack.c.bf16 %v1884_v15, %v1075_v16 }
 0x511   : > { %v1887_v18 = vpop.f32.mrb[38].mxu0  ;;  %2125 = vmatprep.subr.bf16.mxu1 %v2124_v17 }
 0x512   : > { %v1085_v34 = vpop.f32.mrb[39].mxu0  ;;  %2127 = vmatpush3.bf16.msra.mxu1 %v2124_v17 }
 0x513   : > { %v2128_v35 = vpack.c.bf16 %v1887_v18, %v1085_v34 }
 0x515   : > { %v1890_v36 = vpop.f32.mrb[40].mxu0  ;;  %2129 = vmatprep.subr.bf16.mxu1 %v2128_v35 }
 0x516   : > { %v1095_v37 = vpop.f32.mrb[41].mxu0  ;;  %2131 = vmatpush3.bf16.msra.mxu1 %v2128_v35 }
 0x517   : > { %v2132_v38 = vpack.c.bf16 %v1890_v36, %v1095_v37 }
 0x519   : > { %v1893_v39 = vpop.f32.mrb[42].mxu0  ;;  %2133 = vmatprep.subr.bf16.mxu1 %v2132_v38 }
 0x51a   : > { %v1105_v42 = vpop.f32.mrb[43].mxu0  ;;  %2135 = vmatpush3.bf16.msra.mxu1 %v2132_v38 }
 0x51b   : > { %v2136_v43 = vpack.c.bf16 %v1893_v39, %v1105_v42 }
 0x51d   : > { %v1896_v44 = vpop.f32.mrb[44].mxu0  ;;  %2137 = vmatprep.subr.bf16.mxu1 %v2136_v43 }
 0x51e   : > { %v1115_v45 = vpop.f32.mrb[45].mxu0  ;;  %2139 = vmatpush3.bf16.msra.mxu1 %v2136_v43 }
 0x51f   : > { %v2140_v46 = vpack.c.bf16 %v1896_v44, %v1115_v45 }
 0x521   : > { %v1899_v47 = vpop.f32.mrb[46].mxu0  ;;  %2141 = vmatprep.subr.bf16.mxu1 %v2140_v46 }
 0x522   : > { %v1125_v48 = vpop.f32.mrb[47].mxu0  ;;  %2143 = vmatpush3.bf16.msra.mxu1 %v2140_v46 }
 0x523   : > { %v2144_v49 = vpack.c.bf16 %v1899_v47, %v1125_v48 }
 0x525   : > { %2145 = vmatprep.subr.bf16.mxu1 %v2144_v49 }
 0x526   : > { %2147 = vmatpush3.bf16.msra.mxu1 %v2144_v49 }
 0x529   : > { %1933 = vmatmul.mubr.f32.vlgmr.msra.gmra.mrb[32].mxu1 %v2613_v19  ;;  %v1420_v19 = vld [vmem:[#allocation7 + $0x190] ss:$0 sm:$0xff] }
 0x52a   : > { %1935 = vmatprep.mubr.f32.mxu1 %v2615_v20 }
 0x52d   : > { %1936 = vmatmul.mubr.f32.gmra.mrb[34].mxu1 %v2619_v21 }
 0x52e   : > { %1938 = vmatprep.mubr.f32.mxu1 %v2621_v22 }
 0x531   : > { %1939 = vmatmul.mubr.f32.gmra.mrb[36].mxu1 %v2625_v23 }
 0x532   : > { %1941 = vmatprep.mubr.f32.mxu1 %v2627_v24 }
 0x535   : > { %1942 = vmatmul.mubr.f32.gmra.mrb[38].mxu1 %v2631_v25 }
 0x536   : > { %1944 = vmatprep.mubr.f32.mxu1 %v2633_v26 }
 0x539   : > { %1945 = vmatmul.mubr.f32.gmra.mrb[40].mxu1 %v2637_v27 }
 0x53a   : > { %1947 = vmatprep.mubr.f32.mxu1 %v2639_v28 }
 0x53d   : > { %1948 = vmatmul.mubr.f32.gmra.mrb[42].mxu1 %v2643_v29 }
 0x53e   : > { %1950 = vmatprep.mubr.f32.mxu1 %v2645_v30 }
 0x541   : > { %1951 = vmatmul.mubr.f32.gmra.mrb[44].mxu1 %v2649_v31 }
 0x542   : > { %1953 = vmatprep.mubr.f32.mxu1 %v2651_v32 }
 0x545   : > { %1954 = vmatmul.mubr.f32.gmra.mrb[46].mxu1 %v2655_v33 }
 0x5fc   : > { %v1934_v20 = vpop.f32.mrb[32].mxu1 }
 0x5fd   : > { %v1210_v21 = vadd.f32 %v1934_v20, %v1420_v19  ;;  %v1204_v22 = vpop.f32.mrb[33].mxu1 }
 0x5fe   : > { %v1205_v23 = vadd.f32 %v1420_v19, %v1204_v22 }
 0x5ff   : > { %1284 = vst [vmem:[%s2728_s18 + $0x8] sm:$0xff] %v1210_v21 }
 0x600   : > { %1283 = vst [vmem:[%s2728_s18] sm:$0xff] %v1205_v23  ;;  %v1937_v24 = vpop.f32.mrb[34].mxu1 }
 0x601   : > { %v1220_v25 = vadd.f32 %v1937_v24, %v1420_v19  ;;  %v1214_v26 = vpop.f32.mrb[35].mxu1 }
 0x602   : > { %v1215_v27 = vadd.f32 %v1420_v19, %v1214_v26 }
 0x603   : > { %1286 = vst [vmem:[%s2728_s18 + $0x18] sm:$0xff] %v1220_v25 }
 0x604   : > { %1285 = vst [vmem:[%s2728_s18 + $0x10] sm:$0xff] %v1215_v27  ;;  %v1940_v28 = vpop.f32.mrb[36].mxu1 }
 0x605   : > { %v1230_v29 = vadd.f32 %v1940_v28, %v1420_v19  ;;  %v1224_v30 = vpop.f32.mrb[37].mxu1 }
 0x606   : > { %v1225_v31 = vadd.f32 %v1420_v19, %v1224_v30 }
 0x607   : > { %1288 = vst [vmem:[%s2728_s18 + $0x28] sm:$0xff] %v1230_v29 }
 0x608   : > { %1287 = vst [vmem:[%s2728_s18 + $0x20] sm:$0xff] %v1225_v31  ;;  %v1943_v32 = vpop.f32.mrb[38].mxu1 }
 0x609   : > { %v1240_v33 = vadd.f32 %v1943_v32, %v1420_v19  ;;  %v1234_v50 = vpop.f32.mrb[39].mxu1 }
 0x60a   : > { %v1235_v51 = vadd.f32 %v1420_v19, %v1234_v50 }
 0x60b   : > { %1290 = vst [vmem:[%s2728_s18 + $0x38] sm:$0xff] %v1240_v33 }
 0x60c   : > { %1289 = vst [vmem:[%s2728_s18 + $0x30] sm:$0xff] %v1235_v51  ;;  %v1946_v52 = vpop.f32.mrb[40].mxu1 }
 0x60d   : > { %v1250_v53 = vadd.f32 %v1946_v52, %v1420_v19  ;;  %v1244_v54 = vpop.f32.mrb[41].mxu1 }
 0x60e   : > { %v1245_v55 = vadd.f32 %v1420_v19, %v1244_v54 }
 0x60f   : > { %1292 = vst [vmem:[%s2728_s18 + $0x48] sm:$0xff] %v1250_v53 }
 0x610   : > { %1291 = vst [vmem:[%s2728_s18 + $0x40] sm:$0xff] %v1245_v55  ;;  %v1949_v56 = vpop.f32.mrb[42].mxu1 }
 0x611   : > { %v1260_v57 = vadd.f32 %v1949_v56, %v1420_v19  ;;  %v1254_v58 = vpop.f32.mrb[43].mxu1 }
 0x612   : > { %v1255_v60 = vadd.f32 %v1420_v19, %v1254_v58 }
 0x613   : > { %1294 = vst [vmem:[%s2728_s18 + $0x58] sm:$0xff] %v1260_v57 }
 0x614   : > { %1293 = vst [vmem:[%s2728_s18 + $0x50] sm:$0xff] %v1255_v60  ;;  %v1952_v61 = vpop.f32.mrb[44].mxu1 }
 0x615   : > { %v1270_v62 = vadd.f32 %v1952_v61, %v1420_v19  ;;  %v1264_v63 = vpop.f32.mrb[45].mxu1 }
 0x616   : > { %v1265_v0 = vadd.f32 %v1420_v19, %v1264_v63 }
 0x617   : > { %1296 = vst [vmem:[%s2728_s18 + $0x68] sm:$0xff] %v1270_v62 }
 0x618   : > { %1295 = vst [vmem:[%s2728_s18 + $0x60] sm:$0xff] %v1265_v0  ;;  %v1955_v40 = vpop.f32.mrb[46].mxu1 }
 0x619   : > { %v1280_v1 = vadd.f32 %v1955_v40, %v1420_v19  ;;  %v1274_v41 = vpop.f32.mrb[47].mxu1 }
 0x61a   : > { %v1275_v2 = vadd.f32 %v1420_v19, %v1274_v41 }
 0x61b   : > { %1298 = vst [vmem:[%s2728_s18 + $0x78] sm:$0xff] %v1280_v1 }
 0x61c   : > { %1297 = vst [vmem:[%s2728_s18 + $0x70] sm:$0xff] %v1275_v2 }
 0x61d   : > { %2318 = shalt.err (!%p2315_p7)
}
 0x61e   : > { %s2319_s10 = scalar_lea.hbm %s2749_s27, 2048  ;;  %s2323_s26 = scalar_lea.hbm %s2799_s3, 8192 }
 0x61f   : > { %p2320_p9 = scmp.ne.s32.totalorder %s2749_s27, %s2319_s10  ;;  %p2324_p5 = scmp.lt.u32.totalorder %s2749_s27, %s2799_s3 }
 0x620   : > { %p2325_p10 = scmp.lt.u32.totalorder %s2323_s26, %s2319_s10  ;;  %p2327_p2 = scmp.lt.u32.totalorder %s2319_s10, %s2749_s27 }
 0x621   : > { %p2321_p12 = pnand %p2320_p9, %p2523_p6 }
 0x622   : > { %p2326_p1 = por %p2325_p10, %p2324_p5 }
 0x623   : > { %p2322_p0 = pneg %p2321_p12 }
 0x624   : > { %p2328_p4 = por %p2327_p2, %p2326_p1 }
 0x626   : > { %p2329_p8 = pnand %p2328_p4, %p2322_p0 }
 0x628   : > { %2332 = shalt.err (!%p2329_p8)
}
 0x629   : > { %s2383_s28 = smov 128   ;;  %s2384_s18 = smov 8  }
 0x62a   : > { %2158 = dma.vmem_to_hbm [thread:$0]  (%p2523_p6), %s2751_s7, 2048, %s2749_s27, %s1300_s16, %s2383_s28, %s2383_s28, %s2384_s18  }
 0x62b PF: > { %p2180_p11 = scmp.ge.s32.totalorder %s2375_s15, 2  ;;  %s1328_s20 = sand.u32 1, %s2363_s12  }
 0x62c   : > { %p2814_p13 = scmp.ne.s32.totalorder %s2804_s19, 0  ;;  %s1329_s8 = scalar_lea.sflag [#allocation4], %s1328_s20 }
 0x62e   : > { %p2172_p3 = pnand %p2180_p11, %p2814_p13 }
 0x630   : > { %2358 = dma.done.wait (!%p2172_p3), %s1329_s8, 2048  }
 0x631   : > { %2360 = vsyncadd (!%p2172_p3), %s1329_s8, 4294965248  ;;  %p17_p7 = scmp.ge.s32.totalorder %s2513_s23, 6   ;;  %s2815_s12 = smov %s2367_s13 }
 0x632   : > { %s2816_s13 = smov %s2371_s14  ;;  %s2817_s14 = smov %s2529_s9 }
 0x633   : > { %s2818_s15 = smov %s2513_s23  ;;  %19 = sbr.rel (!%p17_p7) target bundleno = 6 (0x6), region = 87 }
 0x63a   :  { %1334 = vsyncpa [#allocation3], 1 }
 0x63b   :  { %1336 = vsyncpa [#allocation3 + $0x1], 1 }
 0x63c   :  { %1337 = vsyncpa [#allocation6], 1 }
 0x63d   :  { %1338 = vsyncpa [#allocation4], 1 }
 0x63e   :  { %1340 = vsyncpa [#allocation4 + $0x1], 1 }

</bundles_post_ra>
